<compile_context>
chip_gen: v6e
topology: v6e:2x2x1
jax: 0.10.0
libtpu: 0.0.40
codegen_flags: <defaults>
</compile_context>

<pallas_src>
import functools

import jax
import jax.numpy as jnp
from jax import lax
from jax.experimental import pallas as pl
from jax.experimental.pallas import tpu as pltpu

EPS = 1e-5
_MIN_PALLAS_BYTES = 16 * 1024        # below this, XLA's fused reduce wins
_TARGET_BLOCK_BYTES = 4 * 1024 * 1024


def _round_up(x, m):
    return ((x + m - 1) // m) * m


def _num_tensorcores():
    """2 on v7x (2 TensorCores visible to one pallas_call), else 1 (v5e/v6e)."""
    try:
        kind = jax.devices()[0].device_kind.lower()
    except Exception:
        return 1
    # v4/v5p megacore could also return 2; review targets v5e/v6e/v7x only.
    return 2 if "7" in kind else 1


def _vmem_cap_bytes():
    """Chip-aware cap for vmem_limit_bytes (v7x has 64 MiB physical per TC)."""
    try:
        kind = jax.devices()[0].device_kind.lower()
    except Exception:
        return 48 * 1024 * 1024
    return 48 * 1024 * 1024 if "7" in kind else 96 * 1024 * 1024


def _divloss_kernel(layer_ref, out_ref, *, d_total, tile_d, tiles_per_core,
                    n_tiles, last_tile_partial):
    c = pl.program_id(0)                 # core shard (parallel)
    j = pl.program_id(1)                 # local feature-tile index (arbitrary)
    t = c * tiles_per_core + j           # global feature-tile index (may be padded)

    @pl.when(j == 0)
    def _init():
        out_ref[...] = jnp.zeros_like(out_ref)

    def _accumulate(mask_cols):
        # Halves are sublane-aligned: layer was reshaped to (2, half, D).
        x1 = layer_ref[0].astype(jnp.float32)
        x2 = layer_ref[1].astype(jnp.float32)
        d = jnp.abs(x1 - x2)
        if mask_cols:
            col = t * tile_d + lax.broadcasted_iota(jnp.int32, d.shape, 1)
            d = jnp.where(col < d_total, d, 0.0)
        # Per-tile partial reduction -> (1, 1); the XLU reduce rides otherwise
        # idle slots in this HBM-bound kernel and the accumulator is one f32.
        out_ref[...] += jnp.sum(d, keepdims=True)

    if last_tile_partial:
        # Mask only the last real tile; full tiles take the cheap path.
        @pl.when(jnp.logical_and(t < n_tiles, t != n_tiles - 1))
        def _full_tile():
            _accumulate(False)

        @pl.when(t == n_tiles - 1)
        def _last_tile():
            _accumulate(True)
    else:
        # Padded iterations (t >= n_tiles) skip compute; their clamped block
        # index equals the core's previous tile, so no extra DMA is issued.
        @pl.when(t < n_tiles)
        def _full_tile():
            _accumulate(False)


def div_loss(noises, layer, *, tile_d=None):
    """Pallas TPU implementation of DivLoss.forward(noises, layer)."""
    if layer.ndim > 2:
        layer = layer.reshape(layer.shape[0], -1)     # matches .view((B, -1))
    elif layer.ndim == 1:
        layer = layer.reshape(layer.shape[0], 1)
    if noises.ndim == 1:
        noises = noises.reshape(noises.shape[0], 1)
    elif noises.ndim > 2:
        noises = noises.reshape(noises.shape[0], -1)

    B, D = layer.shape
    half = B // 2                                     # odd batch drops last row (matches torch)
    itemsize = layer.dtype.itemsize

    # Noise mean: KB-sized -> plain XLA in the wrapper (removes the redundant
    # per-core epilogue reduce and a resident pipeline input from the kernel).
    e1 = noises[:half].astype(jnp.float32)
    e2 = noises[half:2 * half].astype(jnp.float32)
    mean_noise = jnp.mean(jnp.abs(e1 - e2))

    # Tiny / degenerate inputs: pallas_call fixed cost would dominate.
    if half == 0 or B * D * itemsize < _MIN_PALLAS_BYTES:
        x1 = layer[:half].astype(jnp.float32)
        x2 = layer[half:2 * half].astype(jnp.float32)
        lz = jnp.mean(jnp.abs(x1 - x2)) / mean_noise
        return 1.0 / (lz + EPS)

    # Sublane-aligned halves; odd B never DMAs the unused last row.
    layer2 = layer[:2 * half].reshape(2, half, D)

    ncores = _num_tensorcores()

    # --- Tile sizing: by bytes (~4 MiB per (2, half, tile_d) block). ---
    # TODO(synk): for huge B where 2*half*128*itemsize > ~8 MiB, tile the half
    # axis as an extra grid dim instead of relying on a single wide block.
    row_bytes = 2 * half * itemsize                   # bytes per feature column per block
    if tile_d is None:
        tile_d = _TARGET_BLOCK_BYTES // max(1, row_bytes)
    if tile_d >= D:
        tile_d = D                                    # single full-width tile (any D allowed)
    else:
        tile_d = max(128, (tile_d // 128) * 128)      # lane dim must be a multiple of 128
        if tile_d >= D:
            tile_d = D

    n_tiles = pl.cdiv(D, tile_d)
    # On v7x give both TensorCores real, balanced work instead of one big tile.
    if ncores == 2 and n_tiles == 1 and D >= 256:
        tile_d = min(D, _round_up(pl.cdiv(D, 2), 128))
        n_tiles = pl.cdiv(D, tile_d)

    ncores = min(ncores, n_tiles)
    tiles_per_core = pl.cdiv(n_tiles, ncores)
    last_tile_partial = (D % tile_d) != 0

    block_bytes = 2 * half * tile_d * itemsize
    vmem_limit = int(min(_vmem_cap_bytes(),
                         max(4 * 1024 * 1024, 2 * block_bytes + 2 * 1024 * 1024)))

    kernel = functools.partial(
        _divloss_kernel, d_total=D, tile_d=tile_d,
        tiles_per_core=tiles_per_core, n_tiles=n_tiles,
        last_tile_partial=last_tile_partial)

    layer_sums = pl.pallas_call(
        kernel,
        out_shape=jax.ShapeDtypeStruct((ncores, 1, 1), jnp.float32),
        grid_spec=pltpu.PrefetchScalarGridSpec(
            num_scalar_prefetch=0,
            grid=(ncores, tiles_per_core),
            in_specs=[
                pl.BlockSpec(
                    (2, half, tile_d),
                    # Clamp padded iterations to the core's previous tile:
                    # block index unchanged -> no fresh DMA, compute is skipped.
                    lambda c, j: (0, 0, jnp.minimum(c * tiles_per_core + j,
                                                    n_tiles - 1))),
            ],
            out_specs=pl.BlockSpec((None, 1, 1), lambda c, j: (c, 0, 0)),
        ),
        compiler_params=pltpu.CompilerParams(
            dimension_semantics=("parallel", "arbitrary"),
            vmem_limit_bytes=vmem_limit,
        ),
    )(layer2)

    mean_layer = jnp.sum(layer_sums) / (half * D)     # combine per-core partials
    lz = mean_layer / mean_noise
    return 1.0 / (lz + EPS)                           # eps added to lz, as in torch


def _reference(noises, layer):
    """Pure-JAX reference (mirrors the PyTorch forward) for correctness checks."""
    if layer.ndim > 2:
        layer = layer.reshape(layer.shape[0], -1)
    half = layer.shape[0] // 2
    lz = jnp.mean(jnp.abs(layer[:half] - layer[half:2 * half])) / jnp.mean(
        jnp.abs(noises[:half] - noises[half:2 * half]))
    return 1.0 / (lz + EPS)


if __name__ == "__main__":
    key = jax.random.PRNGKey(0)
    k1, k2 = jax.random.split(key)

    # B=8, noise_dim=32, layer activations (8, 4, 20, 20) -> D = 1600:
    # at tile_d=512 this exercises init / accumulate / last-tile mask / epilogue.
    B, NOISE_DIM = 8, 32
    C, H, W = 4, 20, 20

    noises = jax.random.normal(k1, (B, NOISE_DIM), dtype=jnp.float32)
    layer = jax.random.normal(k2, (B, C, H, W), dtype=jnp.float32)

    # f32 path with explicit multi-tile tiling.
    loss = div_loss(noises, layer, tile_d=512)
    jax.block_until_ready(loss)
    ref = _reference(noises, layer)
    assert jnp.allclose(loss, ref, rtol=1e-5, atol=1e-6), (loss, ref)

    # Default byte-targeted tiling path.
    loss_auto = div_loss(noises, layer)
    jax.block_until_ready(loss_auto)
    assert jnp.allclose(loss_auto, ref, rtol=1e-5, atol=1e-6), (loss_auto, ref)

    # bf16 activations go straight into the same kernel (no host-side up-cast);
    # accumulation stays f32 in-kernel.
    noises_bf16 = noises.astype(jnp.bfloat16)
    layer_bf16 = layer.astype(jnp.bfloat16)
    loss_bf16 = div_loss(noises_bf16, layer_bf16, tile_d=512)
    jax.block_until_ready(loss_bf16)
    ref_bf16 = _reference(noises_bf16.astype(jnp.float32),
                          layer_bf16.astype(jnp.float32))
    assert jnp.allclose(loss_bf16, ref_bf16, rtol=1e-3, atol=1e-4), (loss_bf16, ref_bf16)

    # Tiny input exercises the no-Pallas fast path (XLA-fused reduction).
    small_noises = jax.random.normal(k1, (4, 32), dtype=jnp.float32)
    small_layer = jax.random.normal(k2, (4, 4, 8, 8), dtype=jnp.float32)
    loss_small = div_loss(small_noises, small_layer)
    jax.block_until_ready(loss_small)
    ref_small = _reference(small_noises, small_layer)
    assert jnp.allclose(loss_small, ref_small, rtol=1e-5, atol=1e-6), (loss_small, ref_small)

    print("KERNEL_OK")
</pallas_src>

<mosaic_0001>
module attributes {stable_mosaic.version = 11 : i64} {
  func.func @_divloss_kernel(%arg0: i32, %arg1: i32, %arg2: memref<2x4x512xf32, #tpu.memory_space<vmem>>, %arg3: memref<1x1x1xf32, #tpu.memory_space<vmem>>) attributes {dimension_semantics = [#tpu.dimension_semantics<parallel>, #tpu.dimension_semantics<arbitrary>], iteration_bounds = array<i64: 1, 4>, scalar_prefetch = 0 : i64, scratch_operands = 0 : i64, tpu.core_type = #tpu.core_type<tc>, window_params = [{transform_indices = @transform_0, window_bounds = array<i64: 2, 4, 512>}, {transform_indices = @transform_1, window_bounds = array<i64: 1, 1, 1>}]} {
    %c4_i32 = arith.constant 4 : i32
    %0 = arith.muli %arg0, %c4_i32 : i32
    %1 = arith.addi %0, %arg1 : i32
    %c0_i32 = arith.constant 0 : i32
    %2 = arith.cmpi eq, %arg1, %c0_i32 : i32
    %3 = arith.extui %2 : i1 to i32
    %c0_i32_0 = arith.constant 0 : i32
    %4 = arith.cmpi ne, %3, %c0_i32_0 : i32
    scf.if %4 {
      %cst = arith.constant 0.000000e+00 : f32
      %13 = vector.broadcast %cst : f32 to vector<1x1xf32>
      %c0 = arith.constant 0 : index
      %c0_5 = arith.constant 0 : index
      %c0_6 = arith.constant 0 : index
      %14 = vector.load %arg3[%c0, %c0_5, %c0_6] : memref<1x1x1xf32, #tpu.memory_space<vmem>>, vector<1x1x1xf32>
      %15 = vector.shape_cast %14 : vector<1x1x1xf32> to vector<1x1xf32>
      %16 = vector.shape_cast %13 : vector<1x1xf32> to vector<1x1x1xf32>
      tpu.vector_store %arg3[%c0, %c0_5, %c0_6], %16 {strides = array<i32>} : memref<1x1x1xf32, #tpu.memory_space<vmem>>, vector<1x1x1xf32>,
    } else {
    }
    %c4_i32_1 = arith.constant 4 : i32
    %5 = arith.cmpi slt, %1, %c4_i32_1 : i32
    %c3_i32 = arith.constant 3 : i32
    %6 = arith.cmpi ne, %1, %c3_i32 : i32
    %7 = arith.andi %5, %6 : i1
    %8 = arith.extui %7 : i1 to i32
    %c0_i32_2 = arith.constant 0 : i32
    %9 = arith.cmpi ne, %8, %c0_i32_2 : i32
    scf.if %9 {
      %c0 = arith.constant 0 : index
      %c0_5 = arith.constant 0 : index
      %c0_6 = arith.constant 0 : index
      %13 = vector.load %arg2[%c0, %c0_5, %c0_6] : memref<2x4x512xf32, #tpu.memory_space<vmem>>, vector<1x4x512xf32>
      %14 = vector.shape_cast %13 : vector<1x4x512xf32> to vector<4x512xf32>
      %c1 = arith.constant 1 : index
      %c0_7 = arith.constant 0 : index
      %c0_8 = arith.constant 0 : index
      %15 = vector.load %arg2[%c1, %c0_7, %c0_8] : memref<2x4x512xf32, #tpu.memory_space<vmem>>, vector<1x4x512xf32>
      %16 = vector.shape_cast %15 : vector<1x4x512xf32> to vector<4x512xf32>
      %17 = arith.subf %14, %16 : vector<4x512xf32>
      %18 = math.absf %17 : vector<4x512xf32>
      %c0_9 = arith.constant 0 : index
      %c0_10 = arith.constant 0 : index
      %c0_11 = arith.constant 0 : index
      %19 = vector.load %arg3[%c0_9, %c0_10, %c0_11] : memref<1x1x1xf32, #tpu.memory_space<vmem>>, vector<1x1x1xf32>
      %20 = vector.shape_cast %19 : vector<1x1x1xf32> to vector<1x1xf32>
      %21 = vector.shape_cast %18 : vector<4x512xf32> to vector<1x4x512xf32>
      %cst = arith.constant dense<0.000000e+00> : vector<1xf32>
      %22 = vector.multi_reduction <add>, %21, %cst [1, 2] : vector<1x4x512xf32> to vector<1xf32>
      %23 = vector.shape_cast %22 : vector<1xf32> to vector<1x1x1xf32>
      %24 = vector.extract %23[0, 0, 0] : f32 from vector<1x1x1xf32>
      %25 = vector.broadcast %24 : f32 to vector<1x1xf32>
      %26 = arith.addf %20, %25 : vector<1x1xf32>
      %c0_12 = arith.constant 0 : index
      %c0_13 = arith.constant 0 : index
      %c0_14 = arith.constant 0 : index
      %27 = vector.load %arg3[%c0_12, %c0_13, %c0_14] : memref<1x1x1xf32, #tpu.memory_space<vmem>>, vector<1x1x1xf32>
      %28 = vector.shape_cast %27 : vector<1x1x1xf32> to vector<1x1xf32>
      %29 = vector.shape_cast %26 : vector<1x1xf32> to vector<1x1x1xf32>
      tpu.vector_store %arg3[%c0_12, %c0_13, %c0_14], %29 {strides = array<i32>} : memref<1x1x1xf32, #tpu.memory_space<vmem>>, vector<1x1x1xf32>,
    } else {
    }
    %c3_i32_3 = arith.constant 3 : i32
    %10 = arith.cmpi eq, %1, %c3_i32_3 : i32
    %11 = arith.extui %10 : i1 to i32
    %c0_i32_4 = arith.constant 0 : i32
    %12 = arith.cmpi ne, %11, %c0_i32_4 : i32
    scf.if %12 {
      %c0 = arith.constant 0 : index
      %c0_5 = arith.constant 0 : index
      %c0_6 = arith.constant 0 : index
      %13 = vector.load %arg2[%c0, %c0_5, %c0_6] : memref<2x4x512xf32, #tpu.memory_space<vmem>>, vector<1x4x512xf32>
      %14 = vector.shape_cast %13 : vector<1x4x512xf32> to vector<4x512xf32>
      %c1 = arith.constant 1 : index
      %c0_7 = arith.constant 0 : index
      %c0_8 = arith.constant 0 : index
      %15 = vector.load %arg2[%c1, %c0_7, %c0_8] : memref<2x4x512xf32, #tpu.memory_space<vmem>>, vector<1x4x512xf32>
      %16 = vector.shape_cast %15 : vector<1x4x512xf32> to vector<4x512xf32>
      %17 = arith.subf %14, %16 : vector<4x512xf32>
      %18 = math.absf %17 : vector<4x512xf32>
      %c512_i32 = arith.constant 512 : i32
      %19 = arith.muli %1, %c512_i32 : i32
      %20 = tpu.iota {dimensions = array<i32: 1>} : vector<4x512xi32>
      %21 = vector.broadcast %19 : i32 to vector<4x512xi32>
      %22 = arith.addi %21, %20 : vector<4x512xi32>
      %c1600_i32 = arith.constant 1600 : i32
      %23 = vector.broadcast %c1600_i32 : i32 to vector<4x512xi32>
      %24 = arith.cmpi slt, %22, %23 : vector<4x512xi32>
      %cst = arith.constant 0.000000e+00 : f32
      %25 = vector.broadcast %cst : f32 to vector<4x512xf32>
      %26 = arith.select %24, %18, %25 : vector<4x512xi1>, vector<4x512xf32>
      %c0_9 = arith.constant 0 : index
      %c0_10 = arith.constant 0 : index
      %c0_11 = arith.constant 0 : index
      %27 = vector.load %arg3[%c0_9, %c0_10, %c0_11] : memref<1x1x1xf32, #tpu.memory_space<vmem>>, vector<1x1x1xf32>
      %28 = vector.shape_cast %27 : vector<1x1x1xf32> to vector<1x1xf32>
      %29 = vector.shape_cast %26 : vector<4x512xf32> to vector<1x4x512xf32>
      %cst_12 = arith.constant dense<0.000000e+00> : vector<1xf32>
      %30 = vector.multi_reduction <add>, %29, %cst_12 [1, 2] : vector<1x4x512xf32> to vector<1xf32>
      %31 = vector.shape_cast %30 : vector<1xf32> to vector<1x1x1xf32>
      %32 = vector.extract %31[0, 0, 0] : f32 from vector<1x1x1xf32>
      %33 = vector.broadcast %32 : f32 to vector<1x1xf32>
      %34 = arith.addf %28, %33 : vector<1x1xf32>
      %c0_13 = arith.constant 0 : index
      %c0_14 = arith.constant 0 : index
      %c0_15 = arith.constant 0 : index
      %35 = vector.load %arg3[%c0_13, %c0_14, %c0_15] : memref<1x1x1xf32, #tpu.memory_space<vmem>>, vector<1x1x1xf32>
      %36 = vector.shape_cast %35 : vector<1x1x1xf32> to vector<1x1xf32>
      %37 = vector.shape_cast %34 : vector<1x1xf32> to vector<1x1x1xf32>
      tpu.vector_store %arg3[%c0_13, %c0_14, %c0_15], %37 {strides = array<i32>} : memref<1x1x1xf32, #tpu.memory_space<vmem>>, vector<1x1x1xf32>,
    } else {
    }
    return
  }
  func.func @transform_0(%arg0: i32, %arg1: i32) -> (i32, i32, i32) {
    %c4_i32 = arith.constant 4 : i32
    %0 = arith.muli %arg0, %c4_i32 : i32
    %1 = arith.addi %0, %arg1 : i32
    %c3_i32 = arith.constant 3 : i32
    %2 = arith.minsi %1, %c3_i32 : i32
    %c0_i32 = arith.constant 0 : i32
    %c0_i32_0 = arith.constant 0 : i32
    %c0_i32_1 = arith.constant 0 : i32
    return %c0_i32, %c0_i32_0, %2 : i32, i32, i32
  }
  func.func @transform_1(%arg0: i32, %arg1: i32) -> (i32, i32, i32) {
    %c0_i32 = arith.constant 0 : i32
    %c0_i32_0 = arith.constant 0 : i32
    %c0_i32_1 = arith.constant 0 : i32
    return %arg0, %c0_i32, %c0_i32_0 : i32, i32, i32
  }
}

</mosaic_0001>

<bundles_post_ra>
// kernel: tpu_custom_call.1
= control target key start
LH: loop header
LB: loop body
LE: loop exit
PB: predicated region body
PF: predicated region fallthrough
CT: control target
= control target key end

     0   :  { %6 = vsyncpa [#allocation3], 0  ;;  %s702_s0 = inlined_call_operand.hbm [shape: f32[2,4,1600], index: 0, kind: input, shape index: {}]   ;;  %s703_s1 = inlined_call_operand.hbm [shape: f32[1,1,1], index: 1, kind: output, shape index: {}]  }
   0x1   :  { %8 = vsyncpa [#allocation3 + $0x1], 0 }
   0x2   :  { %9 = vsyncpa [#allocation4], 0  ;;  %s560_s6 = smov 0   ;;  %s562_s7 = smov 0  }
   0x3   :  { %s564_s8 = smov 0   ;;  %s566_s9 = smov 0  }
   0x4   :  { %s568_s10 = smov 0   ;;  %s570_s11 = smov 0  }
   0x5 LB: > { %s24_s12 = sadd.s32 1, %s539_s10  ;;  %p33_p1 = scmp.lt.s32.totalorder %s539_s10, 3  ;;  %s543_s11 = sphi %s570_s11, %s15_s11   ;;  %s539_s10 = sphi %s568_s10, %s710_s10   ;;  %s535_s9 = sphi %s566_s9, %s709_s9   ;;  %s531_s8 = sphi %s564_s8, %s708_s8   ;;  %s527_s7 = sphi %s562_s7, %s707_s7   ;;  %s523_s6 = sphi %s560_s6, %s706_s6  }
   0x6   : > { %p25_p0 = scmp.ge.s32.totalorder %s24_s12, 4  ;;  %s349_s13 = sadd.s32 4294967295, %s543_s11  }
   0x7   : > { %p49_p2 = scmp.ne.s32.totalorder %s531_s8, %s527_s7  ;;  %p50_p4 = scmp.eq.s32.totalorder %s543_s11, 0 }
   0x8   : > { %s712_s12 = smov (%p25_p0, %s24_s12), 0  ;;  %p55_p5 = scmp.ne.s32.totalorder %s527_s7, %s523_s6 }
   0x9   : > { %s596_s14 = scalar_select %p33_p1, %s539_s10, 3 }
   0xa   : > { %p37_p3 = scmp.lt.s32.totalorder %s712_s12, 3  ;;  %p56_p6 = scmp.eq.s32.totalorder %s349_s13, 0 }
   0xb   : > { %p51_p7 = por %p50_p4, %p49_p2  ;;  %s42_s18 = sadd.s32 1, %s531_s8 }
   0xc   : > { %s38_s15 = scalar_select %p37_p3, %s712_s12, 3 }
   0xd   : > { %p604_p8 = por %p56_p6, %p55_p5  ;;  %p351_p10 = scmp.ge.s32.totalorder %s543_s11, 4 }
   0xe   : > { %s39_s17 = ssub.s32 %s596_s14, %s38_s15 }
   0xf   : > { %p40_p9 = scmp.eq.s32.totalorder %s39_s17, 0  ;;  %101 = sbr.rel (%p351_p10) target bundleno = 43 (0x2b), region = 16 }
  0x11   : > { %s611_s19 = scalar_select %p40_p9, %s531_s8, %s42_s18  }
  0x14   : > { %104 = sbr.rel (!%p51_p7) target bundleno = 43 (0x2b), region = 20  ;;  %s105_s20 = sand.u32 (%p51_p7), 1, %s531_s8  }
  0x15   : > { %s353_s21 = sshll.u32 (%p51_p7), %s596_s14, 2  ;;  %s352_s22 = sshll.u32 (%p51_p7), %s105_s20, 5 }
  0x16   : > { %s115_s23 = ssub.s32 (%p51_p7), 13, %s353_s21  ;;  %s622_s26 = scalar_lea.sflag (%p51_p7), [#allocation3], %s105_s20 }
  0x17   : > { %p116_p11 = scmp.lt.s32.totalorder (%p51_p7), %s115_s23, 4  ;;  %s109_s27 = scalar_lea.vmem (%p51_p7), [#allocation2], %s352_s22 }
  0x19   : > { %s714_s23 = smov (!%p116_p11, %s115_s23), 4 }
  0x1a   : > { %s619_s24 = sshll.u32 %s714_s23, 7 }
  0x1b   : > { %s120_s25 = ssub.s32 512, %s619_s24 }
  0x1c   : > { %121 = vsyncadd %s622_s26, %s120_s25  ;;  %p355_p12 = scmp.ne.s32.totalorder %s619_s24, 0  ;;  %s373_s28 = sshll.u32 %s596_s14, 8 }
  0x1d   : > { %s124_s2 = scalar_lea.hbm %s702_s0, %s373_s28  ;;  %s357_s3 = sshll.u32 %s714_s23, 2 }
  0x1e   : > { %s127_s4 = sshll.u32 %s109_s27, 4  ;;  %s545_s6 = smov [#allocation2]   ;;  %s128_s4 = int_to_ptr.vmem [resolvable:$true] %s127_s4 }
  0x1f   : > { %s451_s5 = scalar_lea.vmem %s128_s4, %s619_s24  ;;  %s455_s15 = sshll.u32 %s545_s6, 4  ;;  %s456_s15 = int_to_ptr.vmem [resolvable:$false] %s455_s15 }
  0x20   : > { %p452_p13 = scmp.ne.s32.totalorder %s128_s4, %s451_s5  ;;  %s457_s17 = scalar_lea.vmem %s456_s15, 1024 }
  0x21   : > { %p458_p2 = scmp.lt.s32.totalorder %s128_s4, %s456_s15  ;;  %p459_p3 = scmp.lt.s32.totalorder %s457_s17, %s451_s5 }
  0x22   : > { %p453_p0 = pnand %p452_p13, %p355_p12 }
  0x23   : > { %p460_p4 = por %p459_p3, %p458_p2 }
  0x24   : > { %p454_p1 = pneg %p453_p0 }
  0x26   : > { %p461_p5 = pnand %p460_p4, %p454_p1 }
  0x28   : > { %464 = shalt.err (!%p461_p5)
}
  0x29   : > { %s546_s14 = smov 832   ;;  %s547_s18 = smov 256  }
  0x2a   : > { %133 = dma.hbm_to_vmem [thread:$0]  (%p355_p12), %s124_s2, %s619_s24, %s128_s4, %s622_s26, %s546_s14, %s547_s18, %s357_s3  }
  0x2b PF: > { %p360_p6 = scmp.ge.s32.totalorder %s543_s11, 1  ;;  %p135_p7 = scmp.lt.s32.totalorder %s543_s11, 5 }
  0x2d   : > { %p136_p9 = pnand %p360_p6, %p135_p7 }
  0x2e   : > { %s141_s20 = sand.u32 (!%p136_p9), 1, %s527_s7  }
  0x2f   : > { %139 = sbr.rel (%p136_p9) target bundleno = 530 (0x212), region = 24  ;;  %s361_s21 = sshll.u32 (!%p136_p9), %s141_s20, 5 }
  0x30   : > { %s142_s22 = scalar_lea.sflag (!%p136_p9), [#allocation3], %s141_s20  ;;  %s641_s23 = scalar_lea.vmem (!%p136_p9), [#allocation2], %s361_s21 }
  0x34   : > { %514 = dma.done.wait (%p604_p8), %s142_s22, 512  }
  0x35   : > { %516 = vsyncadd (%p604_p8), %s142_s22, 4294966784  ;;  %p362_p10 = scmp.ne.s32.totalorder %s535_s9, 0 }
  0x37   : > { %173 = sbr.rel (%p362_p10) target bundleno = 62 (0x3e), region = 32 }
  0x3c   : > { %vm174_vm0 = vcmask 0   ;;  %v548_v0 = vmov 0.0  }
  0x3d   : > { %175 = vst.msk [vmem:[#allocation5] sm:$0x1] %vm174_vm0, %v548_v0 }
  0x3e PF: > { %p176_p11 = scmp.lt.s32.totalorder %s535_s9, 4  ;;  %p177_p12 = scmp.ne.s32.totalorder %s535_s9, 3 }
  0x40   : > { %p178_p13 = pnand %p177_p12, %p176_p11 }
  0x42   : > { %181 = sbr.rel (%p178_p13) target bundleno = 289 (0x121), region = 36 }
  0x47   : > { %v182_v1 = vld [vmem:[%s641_s23] sm:$0xff]  ;;  %v183_v2 = vld [vmem:[%s641_s23 + $0x8] sm:$0xff]  ;;  %v363_v3 = vld [vmem:[%s641_s23 + $0x10] sm:$0xff]  ;;  %vm198_vm1 = vcmask 1043456   ;;  %vm217_vm2 = vcmask 0  }
  0x48   : > { %v364_v4 = vld [vmem:[%s641_s23 + $0x18] sm:$0xff]  ;;  %v187_v5 = vsub.f32 %v182_v1, %v363_v3  ;;  %v191_v25 = vld [vmem:[#allocation5] sm:$0x1] }
  0x49   : > { %v188_v6 = vsub.f32 %v183_v2, %v364_v4 }
  0x4a   : > { %v189_v7 = vand.u32 2147483647, %v187_v5 }
  0x4b   : > { %v190_v8 = vand.u32 2147483647, %v188_v6 }
  0x4c   : > { %v194_v9 = vcombine.high %v189_v7, %v189_v7  ;;  %v199_v10 = vsel %vm198_vm1, %v189_v7, 0.0 }
  0x4d   : > { %v195_v11 = vcombine.high %v190_v8, %v190_v8  ;;  %v202_v13 = vsel %vm198_vm1, %v190_v8, 0.0 }
  0x4e   : > { %v200_v12 = vsel %vm198_vm1, %v194_v9, 0.0 }
  0x4f   : > { %v201_v14 = vadd.f32 %v200_v12, %v199_v10  ;;  %v204_v15 = vsel %vm198_vm1, %v195_v11, 0.0 }
  0x51   : > { %v203_v16 = vadd.f32 %v202_v13, %v201_v14 }
  0x53   : > { %v205_v17 = vadd.f32 %v204_v15, %v203_v16 }
  0x55   : > { %206 = vadd.xlane.f32.xlu0 %v205_v17 }
  0xde   : > { %v207_v18 = vpop.xlane.xlu0 %206 }
  0xdf   : > { %v208_v19 = vrot.slane %v207_v18, 4 }
  0xe1   : > { %v209_v20 = vadd.f32 %v208_v19, %v207_v18 }
  0xe3   : > { %v210_v21 = vrot.slane %v209_v20, 2 }
  0xe5   : > { %v211_v22 = vadd.f32 %v210_v21, %v209_v20 }
  0xe7   : > { %v212_v23 = vrot.slane %v211_v22, 1 }
  0xe9   : > { %v213_v24 = vadd.f32 %v212_v23, %v211_v22 }
  0xeb   : > { %376 = vpush %v213_v24 }
 0x11c   : > { %s377_s16 = spop %376 }
 0x11d   : > { %v215_v26 = vstv %s377_s16 }
 0x11e   : > { %v216_v27 = vadd.f32 %v215_v26, %v191_v25 }
 0x120   : > { %218 = vst.msk [vmem:[#allocation5] sm:$0x1] %vm217_vm2, %v216_v27 }
 0x121 PF: > { %222 = sbr.rel (%p177_p12) target bundleno = 515 (0x203), region = 40  ;;  %s368_s24 = sshll.u32 (!%p177_p12), %s535_s9, 9 }
 0x126   : > { %v223_v28 = vld [vmem:[%s641_s23] sm:$0xff]  ;;  %v224_v29 = vld [vmem:[%s641_s23 + $0x8] sm:$0xff]  ;;  %v366_v30 = vld [vmem:[%s641_s23 + $0x10] sm:$0xff]  ;;  %v233_v31 = vlaneseq  ;;  %v238_v36 = vstv %s368_s24  ;;  %vm258_vm3 = vcmask 1043456   ;;  %vm277_vm8 = vcmask 0  }
 0x127   : > { %v367_v32 = vld [vmem:[%s641_s23 + $0x18] sm:$0xff]  ;;  %v228_v33 = vsub.f32 %v223_v28, %v366_v30  ;;  %v257_v2 = vld [vmem:[#allocation5] sm:$0x1] }
 0x128   : > { %v229_v34 = vsub.f32 %v224_v29, %v367_v32  ;;  %v234_v35 = vand.u32 127, %v233_v31 }
 0x129   : > { %v230_v37 = vand.u32 2147483647, %v228_v33 }
 0x12a   : > { %v231_v38 = vand.u32 2147483647, %v229_v34  ;;  %v235_v39 = vadd.s32 128, %v234_v35  ;;  %v236_v40 = vadd.s32 256, %v234_v35  ;;  %v237_v41 = vadd.s32 384, %v234_v35 }
 0x12b   : > { %v239_v42 = vadd.s32 %v238_v36, %v234_v35  ;;  %v249_v43 = vcombine.high %v230_v37, %v230_v37 }
 0x12c   : > { %v240_v44 = vadd.s32 %v238_v36, %v235_v39  ;;  %v241_v45 = vadd.s32 %v238_v36, %v236_v40  ;;  %v242_v46 = vadd.s32 %v238_v36, %v237_v41  ;;  %v250_v47 = vcombine.high %v231_v38, %v231_v38 }
 0x12d   : > { %vm243_vm4 = vcmp.lt.s32.totalorder %v239_v42, 1600 }
 0x12e   : > { %vm244_vm5 = vcmp.lt.s32.totalorder %v240_v44, 1600  ;;  %vm245_vm6 = vcmp.lt.s32.totalorder %v241_v45, 1600  ;;  %vm246_vm7 = vcmp.lt.s32.totalorder %v242_v46, 1600  ;;  %v253_v48 = vsel %vm243_vm4, %v230_v37, 0.0 }
 0x12f   : > { %v254_v49 = vsel %vm244_vm5, %v249_v43, 0.0  ;;  %v255_v50 = vsel %vm245_vm6, %v231_v38, 0.0  ;;  %v256_v51 = vsel %vm246_vm7, %v250_v47, 0.0  ;;  %v259_v52 = vsel %vm258_vm3, %v253_v48, 0.0 }
 0x130   : > { %v260_v53 = vsel %vm258_vm3, %v254_v49, 0.0  ;;  %v262_v54 = vsel %vm258_vm3, %v255_v50, 0.0  ;;  %v264_v56 = vsel %vm258_vm3, %v256_v51, 0.0 }
 0x131   : > { %v261_v55 = vadd.f32 %v260_v53, %v259_v52 }
 0x133   : > { %v263_v57 = vadd.f32 %v262_v54, %v261_v55 }
 0x135   : > { %v265_v58 = vadd.f32 %v264_v56, %v263_v57 }
 0x137   : > { %266 = vadd.xlane.f32.xlu0 %v265_v58 }
 0x1c0   : > { %v267_v59 = vpop.xlane.xlu0 %266 }
 0x1c1   : > { %v268_v60 = vrot.slane %v267_v59, 4 }
 0x1c3   : > { %v269_v61 = vadd.f32 %v268_v60, %v267_v59 }
 0x1c5   : > { %v270_v62 = vrot.slane %v269_v61, 2 }
 0x1c7   : > { %v271_v63 = vadd.f32 %v270_v62, %v269_v61 }
 0x1c9   : > { %v272_v0 = vrot.slane %v271_v63, 1 }
 0x1cb   : > { %v273_v1 = vadd.f32 %v272_v0, %v271_v63 }
 0x1cd   : > { %378 = vpush %v273_v1 }
 0x1fe   : > { %s379_s9 = spop %378 }
 0x1ff   : > { %v275_v3 = vstv %s379_s9 }
 0x200   : > { %v276_v4 = vadd.f32 %v275_v3, %v257_v2 }
 0x202   : > { %278 = vst.msk [vmem:[#allocation5] sm:$0x1] %vm277_vm8, %v276_v4 }
 0x203 PF: > { %p669_p8 = scmp.eq.s32.totalorder %s349_s13, 3  ;;  %s549_s26 = smov [#allocation5]  }
 0x204   : > { %s288_s27 = sshll.u32 %s549_s26, 4  ;;  %s289_s27 = int_to_ptr.vmem [resolvable:$true] %s288_s27 }
 0x205   : > { %s465_s28 = scalar_lea.vmem %s289_s27, 16  ;;  %s471_s29 = scalar_lea.vmem %s289_s27, 32 }
 0x206   : > { %p466_p0 = scmp.ne.s32.totalorder %s289_s27, %s465_s28  ;;  %p472_p3 = scmp.lt.s32.totalorder %s289_s27, %s289_s27 }
 0x207   : > { %p473_p4 = scmp.lt.s32.totalorder %s471_s29, %s465_s28 }
 0x208   : > { %p467_p1 = pnand %p466_p0, %p669_p8 }
 0x209   : > { %p474_p5 = por %p473_p4, %p472_p3 }
 0x20a   : > { %p468_p2 = pneg %p467_p1 }
 0x20c   : > { %p475_p6 = pnand %p474_p5, %p468_p2 }
 0x20e   : > { %478 = shalt.err (!%p475_p6)
}
 0x20f   : > { %382 = dma.vmem_to_hbm [thread:$0]  (%p669_p8), %s289_s27, 16, %s703_s1, [#allocation4]  }
 0x210   : > { %518 = dma.done.wait (%p669_p8), [#allocation4], 16  }
 0x211   : > { %520 = vsyncadd (%p669_p8), [#allocation4], 4294967280 }
 0x212 PF: > { %s15_s11 = sadd.s32 1, %s543_s11   ;;  %s706_s6 = smov %s527_s7 }
 0x213   : > { %p12_p7 = scmp.ge.s32.totalorder %s15_s11, 6   ;;  %s707_s7 = smov %s531_s8 }
 0x214   : > { %s708_s8 = smov %s611_s19  ;;  %s709_s9 = smov %s539_s10 }
 0x215   : > { %s710_s10 = smov %s712_s12  ;;  %14 = sbr.rel (!%p12_p7) target bundleno = 5 (0x5), region = 76 }
 0x21a   :  { %301 = vsyncpa [#allocation3], 1 }
 0x21b   :  { %303 = vsyncpa [#allocation3 + $0x1], 1 }
 0x21c   :  { %304 = vsyncpa [#allocation4], 1 }
 0x21d   :  { %306 = vsyncpa [#allocation4 + $0x1], 1 }

</bundles_post_ra>
